<compile_context>
chip_gen: v6e
topology: v6e:2x2x1
jax: 0.10.0
libtpu: 0.0.40
codegen_flags: <defaults>
</compile_context>

<pallas_src>
import jax
import jax.numpy as jnp
from jax.experimental import pallas as pl
from jax.experimental.pallas import tpu as pltpu


def _round_up(n, m):
    return pl.cdiv(n, m) * m


def _mlp_kernel(x_ref, w1_ref, b1_ref, w2_ref, b2_ref, out_ref, bot_ref):
    # hidden = LeakyReLU(x @ W1 + b1, 0.1)   (== MLP[:3](x); dropout = identity)
    # Cast x -> bf16 in-kernel (rides the VPU for free in this mem-bound
    # regime); both matmuls accumulate in f32, epilogue stays f32 (v5e VPU has
    # no bf16 ALU).
    x = x_ref[...].astype(jnp.bfloat16)
    h = jnp.dot(x, w1_ref[...], preferred_element_type=jnp.float32) + b1_ref[...]
    h = jnp.where(h > 0, h, 0.1 * h)
    bot_ref[...] = h.astype(bot_ref.dtype)
    # out = hidden @ W2 + b2   (no final activation: final_activation=False)
    o = jnp.dot(h.astype(w2_ref.dtype), w2_ref[...],
                preferred_element_type=jnp.float32) + b2_ref[...]
    out_ref[...] = o.astype(out_ref.dtype)


def _vmem_capacity_bytes():
    try:
        return int(pltpu.get_tpu_info().vmem_capacity_bytes)
    except Exception:
        return None


def _pick_tile_rows(N, D, P, x_bytes, out_bytes, budget_bytes):
    """Largest 16-aligned row tile whose double-buffered streams fit the budget."""
    # Per-row double-buffered streams: x in, x_imp out, bottleneck out (+ f32 h).
    per_row = 2 * D * x_bytes + 2 * D * out_bytes + 2 * P * out_bytes + 4 * P
    # Resident operands; assume 2 buffers (worst case if Buffered(1) is ignored).
    weight_bytes = 2 * (2 * D * P + 2 * P * D + 4 * P + 4 * D)
    avail = max(budget_bytes - weight_bytes, 1 << 20)
    max_rows = max(int(avail // per_row), 16)
    want_rows = 1024 if D <= 1024 else 512   # v6e: 1024-row tiles ~86% roofline
    tile = min(want_rows, max_rows, _round_up(N, 16))
    tile = max(16, (tile // 16) * 16)        # bf16 packs (16,128) per vreg
    # Guarantee >= 2 grid programs so v7x's two TensorCores both get work.
    if pl.cdiv(N, tile) < 2 and N > 16:
        tile = min(tile, _round_up(pl.cdiv(N, 2), 16))
    return tile


def mlp_forward(x, w1, b1, w2, b2, *, block_rows=None, out_dtype=jnp.bfloat16):
    """Returns (x_imp, bottleneck_output) matching the PyTorch module (eval mode).

    x: [N, D]; w1: [D, P], b1: [1, P] or [P]; w2: [P, D], b2: [1, D] or [D]
    (weights are transposed vs torch's [out, in] so the kernel computes x @ W).
    """
    N, D = x.shape
    P = w1.shape[1]

    # Weights/biases are tiny and VMEM-resident -> cast once in the wrapper.
    # x itself is NOT touched here (no extra HBM pass).
    w1b = w1.astype(jnp.bfloat16)
    w2b = w2.astype(jnp.bfloat16)
    b1f = b1.astype(jnp.float32).reshape(1, P)
    b2f = b2.astype(jnp.float32).reshape(1, D)

    x_bytes = jnp.dtype(x.dtype).itemsize
    out_bytes = jnp.dtype(out_dtype).itemsize

    capacity = _vmem_capacity_bytes()
    # Tile-sizing budget ~40% of physical VMEM; conservative 12 MiB fallback
    # fits every generation's default scoped limit.
    budget = int(capacity * 0.4) if capacity else (12 << 20)
    if block_rows is None:
        tile_n = _pick_tile_rows(N, D, P, x_bytes, out_bytes, budget)
    else:
        tile_n = block_rows
    tile_n = max(16, min(_round_up(tile_n, 16), _round_up(N, 16)))

    grid = (pl.cdiv(N, tile_n),)   # ragged last block is masked by Pallas

    # Raise the scoped-VMEM limit explicitly when the chip is known (v5e's
    # default is only 16 MiB); stays well under physical capacity.
    vmem_limit = int(capacity * 0.5) if capacity else None

    out_shapes = (
        jax.ShapeDtypeStruct((N, D), out_dtype),   # x_imp
        jax.ShapeDtypeStruct((N, P), out_dtype),   # bottleneck_output
    )

    row_spec = lambda d: pl.BlockSpec((tile_n, d), lambda i: (i, 0))

    def build(single_buffer_weights):
        if single_buffer_weights:
            # Same block index every step -> resident in VMEM; a second
            # pipeline buffer is dead weight, keep a single buffer.
            resident = lambda shape: pl.BlockSpec(
                shape, lambda i: (0, 0), pipeline_mode=pl.Buffered(1))
        else:
            resident = lambda shape: pl.BlockSpec(shape, lambda i: (0, 0))
        return pl.pallas_call(
            _mlp_kernel,
            out_shape=out_shapes,
            grid_spec=pl.GridSpec(
                grid=grid,
                in_specs=[
                    row_spec(D),        # x tile (tile_n, D), incoming dtype
                    resident((D, P)),   # W1  bf16
                    resident((1, P)),   # b1  f32
                    resident((P, D)),   # W2  bf16
                    resident((1, D)),   # b2  f32
                ],
                out_specs=(row_spec(D), row_spec(P)),
            ),
            compiler_params=pltpu.CompilerParams(
                # Row tiles are independent -> shard across both TCs on v7x.
                dimension_semantics=("parallel",),
                vmem_limit_bytes=vmem_limit,
            ),
        )

    try:
        x_imp, bottleneck = build(True)(x, w1b, b1f, w2b, b2f)
    except Exception:
        # Fallback if this jax build rejects pipeline_mode on pallas_call specs.
        x_imp, bottleneck = build(False)(x, w1b, b1f, w2b, b2f)
    return x_imp, bottleneck


def init_linear(key, fan_in, fan_out):
    """Deterministic init mimicking torch.nn.Linear defaults (uniform +-1/sqrt(fan_in))."""
    kw, kb = jax.random.split(key)
    bound = 1.0 / (fan_in ** 0.5)
    # stored as [fan_in, fan_out] (transpose of torch's [out, in]) for x @ W
    w = jax.random.uniform(kw, (fan_in, fan_out), jnp.float32, -bound, bound)
    b = jax.random.uniform(kb, (1, fan_out), jnp.float32, -bound, bound)
    return w, b


if __name__ == "__main__":
    key = jax.random.PRNGKey(0)
    kx, k1, k2 = jax.random.split(key, 3)

    # Small shapes; N=20 exercises the multi-step grid + ragged last tile.
    N, D, P = 20, 64, 32
    x = jax.random.normal(kx, (N, D), jnp.float32)
    w1, b1 = init_linear(k1, D, P)   # Linear(D -> P)
    w2, b2 = init_linear(k2, P, D)   # Linear(P -> D)

    x_imp, bottleneck = mlp_forward(x, w1, b1, w2, b2)
    jax.block_until_ready((x_imp, bottleneck))

    # Reference (eval-mode dropout == identity), with matmul operands rounded
    # to bf16 exactly the way the kernel consumes them.
    xb = x.astype(jnp.bfloat16).astype(jnp.float32)
    w1b = w1.astype(jnp.bfloat16).astype(jnp.float32)
    w2b = w2.astype(jnp.bfloat16).astype(jnp.float32)
    h_ref = xb @ w1b + b1
    h_ref = jnp.where(h_ref > 0, h_ref, 0.1 * h_ref)
    o_ref = h_ref.astype(jnp.bfloat16).astype(jnp.float32) @ w2b + b2

    assert x_imp.shape == (N, D) and bottleneck.shape == (N, P)
    assert x_imp.dtype == jnp.bfloat16 and bottleneck.dtype == jnp.bfloat16
    assert jnp.allclose(bottleneck.astype(jnp.float32), h_ref, atol=3e-2), \
        "bottleneck mismatch"
    assert jnp.allclose(x_imp.astype(jnp.float32), o_ref, atol=3e-2), \
        "output mismatch"

    print("KERNEL_OK")
</pallas_src>

<mosaic_0001>
module attributes {stable_mosaic.version = 11 : i64} {
  func.func @_mlp_kernel(%arg0: i32, %arg1: memref<16x64xf32, #tpu.memory_space<vmem>>, %arg2: memref<64x32xbf16, #tpu.memory_space<vmem>>, %arg3: memref<1x32xf32, #tpu.memory_space<vmem>>, %arg4: memref<32x64xbf16, #tpu.memory_space<vmem>>, %arg5: memref<1x64xf32, #tpu.memory_space<vmem>>, %arg6: memref<16x64xbf16, #tpu.memory_space<vmem>>, %arg7: memref<16x32xbf16, #tpu.memory_space<vmem>>) attributes {dimension_semantics = [#tpu.dimension_semantics<parallel>], iteration_bounds = array<i64: 2>, scalar_prefetch = 0 : i64, scratch_operands = 0 : i64, tpu.core_type = #tpu.core_type<tc>, window_params = [{transform_indices = @transform_0, window_bounds = array<i64: 16, 64>}, {pipeline_mode = #tpu.pipeline_mode<synchronous>, transform_indices = @transform_1, window_bounds = array<i64: 64, 32>}, {pipeline_mode = #tpu.pipeline_mode<synchronous>, transform_indices = @transform_2, window_bounds = array<i64: 1, 32>}, {pipeline_mode = #tpu.pipeline_mode<synchronous>, transform_indices = @transform_3, window_bounds = array<i64: 32, 64>}, {pipeline_mode = #tpu.pipeline_mode<synchronous>, transform_indices = @transform_4, window_bounds = array<i64: 1, 64>}, {transform_indices = @transform_5, window_bounds = array<i64: 16, 64>}, {transform_indices = @transform_6, window_bounds = array<i64: 16, 32>}]} {
    %c0 = arith.constant 0 : index
    %c0_0 = arith.constant 0 : index
    %0 = vector.load %arg1[%c0, %c0_0] : memref<16x64xf32, #tpu.memory_space<vmem>>, vector<16x64xf32>
    %1 = arith.truncf %0 : vector<16x64xf32> to vector<16x64xbf16>
    %c0_1 = arith.constant 0 : index
    %c0_2 = arith.constant 0 : index
    %2 = vector.load %arg2[%c0_1, %c0_2] : memref<64x32xbf16, #tpu.memory_space<vmem>>, vector<64x32xbf16>
    %cst = arith.constant dense<0.000000e+00> : vector<16x32xf32>
    %3 = tpu.matmul %1, %2, %cst {dimension_numbers = #tpu.dot_dimension_numbers<[1], [0], [0], [1], [0, 0, 1, 1], [], []>} : vector<16x64xbf16>, vector<64x32xbf16>, vector<16x32xf32> -> vector<16x32xf32>
    %c0_3 = arith.constant 0 : index
    %c0_4 = arith.constant 0 : index
    %4 = vector.load %arg3[%c0_3, %c0_4] : memref<1x32xf32, #tpu.memory_space<vmem>>, vector<1x32xf32>
    %5 = vector.broadcast %4 : vector<1x32xf32> to vector<16x32xf32>
    %6 = arith.addf %3, %5 : vector<16x32xf32>
    %cst_5 = arith.constant 0.000000e+00 : f32
    %7 = vector.broadcast %cst_5 : f32 to vector<16x32xf32>
    %8 = arith.cmpf ogt, %6, %7 : vector<16x32xf32>
    %cst_6 = arith.constant 1.000000e-01 : f32
    %9 = vector.broadcast %cst_6 : f32 to vector<16x32xf32>
    %10 = arith.mulf %9, %6 : vector<16x32xf32>
    %11 = arith.select %8, %6, %10 : vector<16x32xi1>, vector<16x32xf32>
    %12 = arith.truncf %11 : vector<16x32xf32> to vector<16x32xbf16>
    %c0_7 = arith.constant 0 : index
    %c0_8 = arith.constant 0 : index
    %13 = vector.load %arg7[%c0_7, %c0_8] : memref<16x32xbf16, #tpu.memory_space<vmem>>, vector<16x32xbf16>
    tpu.vector_store %arg7[%c0_7, %c0_8], %12 {strides = array<i32>} : memref<16x32xbf16, #tpu.memory_space<vmem>>, vector<16x32xbf16>,
    %14 = arith.truncf %11 : vector<16x32xf32> to vector<16x32xbf16>
    %c0_9 = arith.constant 0 : index
    %c0_10 = arith.constant 0 : index
    %15 = vector.load %arg4[%c0_9, %c0_10] : memref<32x64xbf16, #tpu.memory_space<vmem>>, vector<32x64xbf16>
    %cst_11 = arith.constant dense<0.000000e+00> : vector<16x64xf32>
    %16 = tpu.matmul %14, %15, %cst_11 {dimension_numbers = #tpu.dot_dimension_numbers<[1], [0], [0], [1], [0, 0, 1, 1], [], []>} : vector<16x32xbf16>, vector<32x64xbf16>, vector<16x64xf32> -> vector<16x64xf32>
    %c0_12 = arith.constant 0 : index
    %c0_13 = arith.constant 0 : index
    %17 = vector.load %arg5[%c0_12, %c0_13] : memref<1x64xf32, #tpu.memory_space<vmem>>, vector<1x64xf32>
    %18 = vector.broadcast %17 : vector<1x64xf32> to vector<16x64xf32>
    %19 = arith.addf %16, %18 : vector<16x64xf32>
    %20 = arith.truncf %19 : vector<16x64xf32> to vector<16x64xbf16>
    %c0_14 = arith.constant 0 : index
    %c0_15 = arith.constant 0 : index
    %21 = vector.load %arg6[%c0_14, %c0_15] : memref<16x64xbf16, #tpu.memory_space<vmem>>, vector<16x64xbf16>
    tpu.vector_store %arg6[%c0_14, %c0_15], %20 {strides = array<i32>} : memref<16x64xbf16, #tpu.memory_space<vmem>>, vector<16x64xbf16>,
    return
  }
  func.func @transform_0(%arg0: i32) -> (i32, i32) {
    %c0_i32 = arith.constant 0 : i32
    %c0_i32_0 = arith.constant 0 : i32
    return %arg0, %c0_i32 : i32, i32
  }
  func.func @transform_1(%arg0: i32) -> (i32, i32) {
    %c0_i32 = arith.constant 0 : i32
    %c0_i32_0 = arith.constant 0 : i32
    %c0_i32_1 = arith.constant 0 : i32
    return %c0_i32, %c0_i32_0 : i32, i32
  }
  func.func @transform_2(%arg0: i32) -> (i32, i32) {
    %c0_i32 = arith.constant 0 : i32
    %c0_i32_0 = arith.constant 0 : i32
    %c0_i32_1 = arith.constant 0 : i32
    return %c0_i32, %c0_i32_0 : i32, i32
  }
  func.func @transform_3(%arg0: i32) -> (i32, i32) {
    %c0_i32 = arith.constant 0 : i32
    %c0_i32_0 = arith.constant 0 : i32
    %c0_i32_1 = arith.constant 0 : i32
    return %c0_i32, %c0_i32_0 : i32, i32
  }
  func.func @transform_4(%arg0: i32) -> (i32, i32) {
    %c0_i32 = arith.constant 0 : i32
    %c0_i32_0 = arith.constant 0 : i32
    %c0_i32_1 = arith.constant 0 : i32
    return %c0_i32, %c0_i32_0 : i32, i32
  }
  func.func @transform_5(%arg0: i32) -> (i32, i32) {
    %c0_i32 = arith.constant 0 : i32
    %c0_i32_0 = arith.constant 0 : i32
    return %arg0, %c0_i32 : i32, i32
  }
  func.func @transform_6(%arg0: i32) -> (i32, i32) {
    %c0_i32 = arith.constant 0 : i32
    %c0_i32_0 = arith.constant 0 : i32
    return %arg0, %c0_i32 : i32, i32
  }
}

module attributes {stable_mosaic.version = 11 : i64} {
  func.func @_mlp_kernel(%arg0: i32, %arg1: memref<16x64xf32, #tpu.memory_space<vmem>>, %arg2: memref<64x32xbf16, #tpu.memory_space<vmem>>, %arg3: memref<1x32xf32, #tpu.memory_space<vmem>>, %arg4: memref<32x64xbf16, #tpu.memory_space<vmem>>, %arg5: memref<1x64xf32, #tpu.memory_space<vmem>>, %arg6: memref<16x64xbf16, #tpu.memory_space<vmem>>, %arg7: memref<16x32xbf16, #tpu.memory_space<vmem>>) attributes {dimension_semantics = [#tpu.dimension_semantics<parallel>], iteration_bounds = array<i64: 2>, scalar_prefetch = 0 : i64, scratch_operands = 0 : i64, tpu.core_type = #tpu.core_type<tc>, window_params = [{transform_indices = @transform_0, window_bounds = array<i64: 16, 64>}, {pipeline_mode = #tpu.pipeline_mode<synchronous>, transform_indices = @transform_1, window_bounds = array<i64: 64, 32>}, {pipeline_mode = #tpu.pipeline_mode<synchronous>, transform_indices = @transform_2, window_bounds = array<i64: 1, 32>}, {pipeline_mode = #tpu.pipeline_mode<synchronous>, transform_indices = @transform_3, window_bounds = array<i64: 32, 64>}, {pipeline_mode = #tpu.pipeline_mode<synchronous>, transform_indices = @transform_4, window_bounds = array<i64: 1, 64>}, {transform_indices = @transform_5, window_bounds = array<i64: 16, 64>}, {transform_indices = @transform_6, window_bounds = array<i64: 16, 32>}]} {
    %c0 = arith.constant 0 : index
    %c0_0 = arith.constant 0 : index
    %0 = vector.load %arg1[%c0, %c0_0] : memref<16x64xf32, #tpu.memory_space<vmem>>, vector<16x64xf32>
    %1 = arith.truncf %0 : vector<16x64xf32> to vector<16x64xbf16>
    %c0_1 = arith.constant 0 : index
    %c0_2 = arith.constant 0 : index
    %2 = vector.load %arg2[%c0_1, %c0_2] : memref<64x32xbf16, #tpu.memory_space<vmem>>, vector<64x32xbf16>
    %cst = arith.constant dense<0.000000e+00> : vector<16x32xf32>
    %3 = tpu.matmul %1, %2, %cst {dimension_numbers = #tpu.dot_dimension_numbers<[1], [0], [0], [1], [0, 0, 1, 1], [], []>} : vector<16x64xbf16>, vector<64x32xbf16>, vector<16x32xf32> -> vector<16x32xf32>
    %c0_3 = arith.constant 0 : index
    %c0_4 = arith.constant 0 : index
    %4 = vector.load %arg3[%c0_3, %c0_4] : memref<1x32xf32, #tpu.memory_space<vmem>>, vector<1x32xf32>
    %5 = vector.broadcast %4 : vector<1x32xf32> to vector<16x32xf32>
    %6 = arith.addf %3, %5 : vector<16x32xf32>
    %cst_5 = arith.constant 0.000000e+00 : f32
    %7 = vector.broadcast %cst_5 : f32 to vector<16x32xf32>
    %8 = arith.cmpf ogt, %6, %7 : vector<16x32xf32>
    %cst_6 = arith.constant 1.000000e-01 : f32
    %9 = vector.broadcast %cst_6 : f32 to vector<16x32xf32>
    %10 = arith.mulf %9, %6 : vector<16x32xf32>
    %11 = arith.select %8, %6, %10 : vector<16x32xi1>, vector<16x32xf32>
    %12 = arith.truncf %11 : vector<16x32xf32> to vector<16x32xbf16>
    %c0_7 = arith.constant 0 : index
    %c0_8 = arith.constant 0 : index
    %13 = vector.load %arg7[%c0_7, %c0_8] : memref<16x32xbf16, #tpu.memory_space<vmem>>, vector<16x32xbf16>
    tpu.vector_store %arg7[%c0_7, %c0_8], %12 {strides = array<i32>} : memref<16x32xbf16, #tpu.memory_space<vmem>>, vector<16x32xbf16>,
    %14 = arith.truncf %11 : vector<16x32xf32> to vector<16x32xbf16>
    %c0_9 = arith.constant 0 : index
    %c0_10 = arith.constant 0 : index
    %15 = vector.load %arg4[%c0_9, %c0_10] : memref<32x64xbf16, #tpu.memory_space<vmem>>, vector<32x64xbf16>
    %cst_11 = arith.constant dense<0.000000e+00> : vector<16x64xf32>
    %16 = tpu.matmul %14, %15, %cst_11 {dimension_numbers = #tpu.dot_dimension_numbers<[1], [0], [0], [1], [0, 0, 1, 1], [], []>} : vector<16x32xbf16>, vector<32x64xbf16>, vector<16x64xf32> -> vector<16x64xf32>
    %c0_12 = arith.constant 0 : index
    %c0_13 = arith.constant 0 : index
    %17 = vector.load %arg5[%c0_12, %c0_13] : memref<1x64xf32, #tpu.memory_space<vmem>>, vector<1x64xf32>
    %18 = vector.broadcast %17 : vector<1x64xf32> to vector<16x64xf32>
    %19 = arith.addf %16, %18 : vector<16x64xf32>
    %20 = arith.truncf %19 : vector<16x64xf32> to vector<16x64xbf16>
    %c0_14 = arith.constant 0 : index
    %c0_15 = arith.constant 0 : index
    %21 = vector.load %arg6[%c0_14, %c0_15] : memref<16x64xbf16, #tpu.memory_space<vmem>>, vector<16x64xbf16>
    tpu.vector_store %arg6[%c0_14, %c0_15], %20 {strides = array<i32>} : memref<16x64xbf16, #tpu.memory_space<vmem>>, vector<16x64xbf16>,
    return
  }
  func.func @transform_0(%arg0: i32) -> (i32, i32) {
    %c0_i32 = arith.constant 0 : i32
    %c0_i32_0 = arith.constant 0 : i32
    return %arg0, %c0_i32 : i32, i32
  }
  func.func @transform_1(%arg0: i32) -> (i32, i32) {
    %c0_i32 = arith.constant 0 : i32
    %c0_i32_0 = arith.constant 0 : i32
    %c0_i32_1 = arith.constant 0 : i32
    return %c0_i32, %c0_i32_0 : i32, i32
  }
  func.func @transform_2(%arg0: i32) -> (i32, i32) {
    %c0_i32 = arith.constant 0 : i32
    %c0_i32_0 = arith.constant 0 : i32
    %c0_i32_1 = arith.constant 0 : i32
    return %c0_i32, %c0_i32_0 : i32, i32
  }
  func.func @transform_3(%arg0: i32) -> (i32, i32) {
    %c0_i32 = arith.constant 0 : i32
    %c0_i32_0 = arith.constant 0 : i32
    %c0_i32_1 = arith.constant 0 : i32
    return %c0_i32, %c0_i32_0 : i32, i32
  }
  func.func @transform_4(%arg0: i32) -> (i32, i32) {
    %c0_i32 = arith.constant 0 : i32
    %c0_i32_0 = arith.constant 0 : i32
    %c0_i32_1 = arith.constant 0 : i32
    return %c0_i32, %c0_i32_0 : i32, i32
  }
  func.func @transform_5(%arg0: i32) -> (i32, i32) {
    %c0_i32 = arith.constant 0 : i32
    %c0_i32_0 = arith.constant 0 : i32
    return %arg0, %c0_i32 : i32, i32
  }
  func.func @transform_6(%arg0: i32) -> (i32, i32) {
    %c0_i32 = arith.constant 0 : i32
    %c0_i32_0 = arith.constant 0 : i32
    return %arg0, %c0_i32 : i32, i32
  }
}

</mosaic_0001>

<bundles_post_ra>
// kernel: tpu_custom_call.1
= control target key start
LH: loop header
LB: loop body
LE: loop exit
PB: predicated region body
PF: predicated region fallthrough
CT: control target
= control target key end

     0   :  { %12 = vsyncpa [#allocation3], 0  ;;  %s1071_s0 = inlined_call_operand.vmem [shape: f32[20,64], index: 0, kind: input, shape index: {}]   ;;  %s1072_s1 = inlined_call_operand.vmem [shape: bf16[64,32], index: 1, kind: input, shape index: {}]   ;;  %s1073_s2 = inlined_call_operand.vmem [shape: f32[1,32], index: 2, kind: input, shape index: {}]   ;;  %s1074_s3 = inlined_call_operand.vmem [shape: bf16[32,64], index: 3, kind: input, shape index: {}]   ;;  %s1075_s4 = inlined_call_operand.vmem [shape: f32[1,64], index: 4, kind: input, shape index: {}]   ;;  %s1076_s5 = inlined_call_operand.hbm [shape: bf16[20,64], index: 5, kind: output, shape index: {0}]   ;;  %s1077_s6 = inlined_call_operand.hbm [shape: bf16[20,32], index: 6, kind: output, shape index: {1}]  }
   0x1   :  { %14 = vsyncpa [#allocation3 + $0x1], 0 }
   0x2   :  { %15 = vsyncpa [#allocation5], 0 }
   0x3   :  { %17 = vsyncpa [#allocation5 + $0x1], 0  ;;  %s879_s21 = smov 0   ;;  %s881_s22 = smov 0  }
   0x4   :  { %s883_s23 = smov 0   ;;  %s885_s24 = smov 0  }
   0x5 LB: > { %s900_s25 = sadd.s32 4294967295, %s834_s24   ;;  %s618_s26 = sadd.s32 4294967294, %s834_s24   ;;  %s834_s24 = sphi %s885_s24, %s1085_s24   ;;  %s830_s23 = sphi %s883_s23, %s1084_s23   ;;  %s826_s22 = sphi %s881_s22, %s1083_s22   ;;  %s822_s21 = sphi %s879_s21, %s1082_s21  }
   0x6   : > { %s904_s27 = sadd.s32 1, %s834_s24   ;;  %s140_s28 = sadd.s32 1, %s830_s23 }
   0x7   : > { %s137_s29 = ssub.s32 %s834_s24, %s904_s27  ;;  %p150_p0 = scmp.ne.s32.totalorder %s830_s23, %s826_s22 }
   0x8   : > { %p138_p1 = scmp.eq.s32.totalorder %s137_s29, 0  ;;  %p151_p2 = scmp.eq.s32.totalorder %s900_s25, 1 }
   0x9   : > { %p156_p3 = scmp.ne.s32.totalorder %s826_s22, %s822_s21  ;;  %p157_p4 = scmp.eq.s32.totalorder %s618_s26, 1 }
   0xa   : > { %s915_s30 = scalar_select %p138_p1, %s830_s23, %s140_s28  }
   0xb   : > { %p917_p5 = por %p151_p2, %p150_p0  ;;  %p921_p6 = por %p157_p4, %p156_p3 }
   0xc   : > { %p621_p7 = scmp.ge.s32.totalorder %s834_s24, 1  ;;  %p230_p8 = scmp.lt.s32.totalorder %s834_s24, 3 }
   0xe   : > { %p231_p9 = pnand %p621_p7, %p230_p8 }
   0xf   : > { %s934_s13 = sshll.u32 (!%p231_p9), %s900_s25, 1  ;;  %s957_s15 = sand.u32 (!%p231_p9), 1, %s826_s22  }
  0x10   : > { %234 = sbr.rel (%p231_p9) target bundleno = 504 (0x1f8), region = 40  ;;  %p274_p10 = scmp.lt.s32.totalorder (!%p231_p9), %s934_s13, 2 }
  0x11   : > { %s622_s16 = sshll.u32 (!%p231_p9), %s957_s15, 3  ;;  %s478_s26 = scalar_lea.sflag (!%p231_p9), [#allocation3], %s957_s15 }
  0x15   : > { %v738_v0 = vld [vmem:[%s1072_s1 + $0x18] sm:$0xff]   ;;  %v836_v1 = vmov 0.0   ;;  %v739_v2 = vld [vmem:[%s1072_s1 + $0x10] sm:$0xff]   ;;  %vm837_vm0 = vmmov 0   ;;  %s275_s14 = scalar_select %p274_p10, %s934_s13, 2  ;;  %v740_v3 = vld [vmem:[%s1072_s1 + $0x8] sm:$0xff]  }
  0x16   : > { %670 = vmatprep.subr.bf16.mxu0 %v836_v1  ;;  %682 = vmatprep.subr.bf16.mxu1 %v836_v1  ;;  %v741_v4 = vld [vmem:[%s1072_s1] sm:$0xff]   ;;  %vm336_vm1 = vcmask 523264   ;;  %v742_v8 = vld [vmem:[%s1074_s3 + $0x8] sm:$0xff]   ;;  %vm395_vm3 = vcmask 257024   ;;  %vm421_vm5 = vcmask 261120   ;;  %vm474_vm6 = vcmask 519168  }
  0x17   : > { %671 = vmatpush3.bf16.msra.mxu0 %v738_v0  ;;  %678 = vmatprep.mubr.msk.bf16.mxu0 %vm837_vm0, %v836_v1  ;;  %s625_s17 = sshll.u32 %s275_s14, 3  ;;  %v743_v9 = vld [vmem:[%s1074_s3] sm:$0xff]   ;;  %s491_s29 = ssub.s32 (%p917_p5), 3, %s934_s13 }
  0x18   : > { %672 = vmatprep.subr.bf16.mxu0 %v836_v1  ;;  %686 = vmatprep.mubr.msk.bf16.mxu1 %vm837_vm0, %v836_v1  ;;  %s277_s20 = scalar_lea.vmem %s1071_s0, %s625_s17  ;;  %v626_v10 = vld [vmem:[%s1073_s2] ss:$0 sm:$0xff]  ;;  %s960_s17 = scalar_lea.vmem [#allocation4], %s622_s16 }
  0x19   : > { %v294_v5 = vld [vmem:[%s277_s20] sm:$0xff]  ;;  %v295_v6 = vld [vmem:[%s277_s20 + $0x8] sm:$0xff]  ;;  %683 = vmatpush3.bf16.msra.mxu1 %v742_v8  ;;  %s261_s20 = scalar_lea.vmem [#allocation2], %s622_s16  ;;  %p492_p11 = scmp.lt.s32.totalorder (%p917_p5), %s491_s29, 2 }
  0x1a   : > { %v296_v7 = vpack.c.bf16 %v295_v6, %v294_v5  ;;  %684 = vmatprep.subr.bf16.mxu1 %v836_v1  ;;  %v634_v24 = vld [vmem:[%s1075_s4] ss:$0 sm:$0xff] }
  0x1b   : > { %673 = vmatpush3.bf16.msra.mxu0 %v739_v2 }
  0x1c   : > { %674 = vmatprep.subr.bf16.mxu0 %v836_v1 }
  0x1d   : > { %685 = vmatpush3.bf16.msra.mxu1 %v743_v9 }
  0x1f   : > { %675 = vmatpush3.bf16.msra.mxu0 %v740_v3 }
  0x20   : > { %676 = vmatprep.subr.bf16.mxu0 %v836_v1 }
  0x23   : > { %677 = vmatpush3.bf16.msra.mxu0 %v741_v4 }
  0x26   : > { %679 = vmatmul.mubr.msk.bf16.vlgmr.msra.gmra.mxu0 %vm336_vm1, %v296_v7 }
  0xe6   : > { %v374_v11 = vpop.f32.mrf.mxu0 }
  0xe7   : > { %v375_v12 = vadd.f32 %v626_v10, %v374_v11 }
  0xe8   : > { %v680_v13 = vpop.f32.mrf.mxu0 }
  0xe9   : > { %vm381_vm2 = vcmp.gt.f32.partialorder %v375_v12, 0.0  ;;  %v383_v14 = vmul.f32 0.1, %v375_v12 }
  0xea   : > { %v377_v15 = vpop.f32.mrf.mxu0 }
  0xeb   : > { %v385_v16 = vsel %vm381_vm2, %v375_v12, %v383_v14  ;;  %v378_v17 = vadd.f32 %v626_v10, %v377_v15 }
  0xec   : > { %v656_v18 = vpack.c.bf16 %v385_v16, %v385_v16  ;;  %v681_v19 = vpop.f32.mrf.mxu0 }
  0xed   : > { %vm382_vm4 = vcmp.gt.f32.partialorder %v378_v17, 0.0  ;;  %v384_v20 = vmul.f32 0.1, %v378_v17 }
  0xee   : > { %396 = vst.msk [vmem:[%s960_s17] sm:$0xf] %vm395_vm3, %v656_v18 }
  0xef   : > { %v386_v21 = vsel %vm382_vm4, %v378_v17, %v384_v20 }
  0xf0   : > { %v387_v22 = vpack.c.bf16 %v386_v21, %v385_v16  ;;  %v657_v23 = vpack.c.bf16 %v386_v21, %v386_v21 }
  0xf2   : > { %687 = vmatmul.mubr.msk.bf16.vlgmr.msra.gmra.mxu1 %vm421_vm5, %v387_v22  ;;  %397 = vst.msk [vmem:[%s960_s17 + $0x4] sm:$0xf] %vm395_vm3, %v657_v23 }
 0x1b2   : > { %v459_v25 = vpop.f32.mrf.mxu1 }
 0x1b3   : > { %v460_v26 = vadd.f32 %v634_v24, %v459_v25 }
 0x1b4   : > { %v688_v27 = vpop.f32.mrf.mxu1 }
 0x1b5   : > { %v658_v28 = vpack.c.bf16 %v460_v26, %v460_v26 }
 0x1b6   : > { %v462_v29 = vpop.f32.mrf.mxu1 }
 0x1b7   : > { %475 = vst.msk [vmem:[%s261_s20] sm:$0xf] %vm474_vm6, %v658_v28  ;;  %v463_v30 = vadd.f32 %v634_v24, %v462_v29  ;;  %489 = sbr.rel (!%p917_p5) target bundleno = 471 (0x1d7), region = 44 }
 0x1b8   : > { %v689_v31 = vpop.f32.mrf.mxu1 }
 0x1b9   : > { %v659_v32 = vpack.c.bf16 %v463_v30, %v463_v30 }
 0x1bb   : > { %476 = vst.msk [vmem:[%s261_s20 + $0x4] sm:$0xf] %vm474_vm6, %v659_v32 }
 0x1bc   : > { %s1087_s29 = smov (!%p492_p11, %s491_s29), 2 }
 0x1bd   : > { %s972_s9 = sshll.u32 %s1087_s29, 6 }
 0x1be   : > { %s496_s10 = ssub.s32 128, %s972_s9 }
 0x1bf   : > { %497 = vsyncadd %s478_s26, %s496_s10  ;;  %p644_p12 = scmp.ne.s32.totalorder %s972_s9, 0  ;;  %s660_s11 = sshll.u32 %s900_s25, 7 }
 0x1c0   : > { %s982_s16 = scalar_lea.hbm %s1076_s5, %s660_s11  ;;  %s502_s18 = sshll.u32 %s261_s20, 4  ;;  %s984_s18 = int_to_ptr.vmem [resolvable:$true] %s502_s18 }
 0x1c1   : > { %s744_s19 = scalar_lea.vmem %s984_s18, %s972_s9  ;;  %s838_s29 = smov [#allocation2]  }
 0x1c2   : > { %p745_p13 = scmp.ne.s32.totalorder %s984_s18, %s744_s19  ;;  %s748_s10 = sshll.u32 %s838_s29, 4  ;;  %s749_s10 = int_to_ptr.vmem [resolvable:$false] %s748_s10 }
 0x1c3   : > { %s750_s28 = scalar_lea.vmem %s749_s10, 256  ;;  %p751_p2 = scmp.lt.s32.totalorder %s984_s18, %s749_s10 }
 0x1c4   : > { %p746_p0 = pnand %p745_p13, %p644_p12  ;;  %p752_p3 = scmp.lt.s32.totalorder %s750_s28, %s744_s19 }
 0x1c6   : > { %p747_p1 = pneg %p746_p0  ;;  %p753_p4 = por %p752_p3, %p751_p2 }
 0x1c8   : > { %p754_p7 = pnand %p753_p4, %p747_p1 }
 0x1ca   : > { %757 = shalt.err (!%p754_p7)
}
 0x1cb   : > { %s758_s20 = scalar_lea.hbm %s982_s16, %s972_s9  ;;  %s762_s14 = scalar_lea.hbm %s1076_s5, 192 }
 0x1cc   : > { %p759_p8 = scmp.ne.s32.totalorder %s982_s16, %s758_s20  ;;  %p763_p11 = scmp.lt.s32.totalorder %s982_s16, %s1076_s5 }
 0x1cd   : > { %p764_p13 = scmp.lt.s32.totalorder %s762_s14, %s758_s20 }
 0x1ce   : > { %p760_p9 = pnand %p759_p8, %p644_p12 }
 0x1cf   : > { %p765_p0 = por %p764_p13, %p763_p11 }
 0x1d0   : > { %p761_p10 = pneg %p760_p9 }
 0x1d2   : > { %p766_p1 = pnand %p765_p0, %p761_p10 }
 0x1d4   : > { %769 = shalt.err (!%p766_p1)
}
 0x1d5   : > { %s839_s28 = smov 64   ;;  %s840_s19 = smov 4  }
 0x1d6   : > { %508 = dma.vmem_to_hbm [thread:$0]  (%p644_p12), %s984_s18, %s972_s9, %s982_s16, %s478_s26, %s839_s28, %s839_s28, %s840_s19  }
 0x1d7 PF: > { %511 = sbr.rel (!%p917_p5) target bundleno = 504 (0x1f8), region = 48  ;;  %s513_s20 = ssub.s32 (%p917_p5), 3, %s934_s13 }
 0x1d8   : > { %p514_p2 = scmp.lt.s32.totalorder (%p917_p5), %s513_s20, 2  ;;  %s1080_s14 = scalar_lea.sflag (%p917_p5), [#allocation5], %s957_s15 }
 0x1dc   : > { %s1089_s20 = smov (!%p514_p2, %s513_s20), 2 }
 0x1dd   : > { %s1014_s11 = sshll.u32 %s1089_s20, 6 }
 0x1de   : > { %s518_s12 = ssub.s32 128, %s1014_s11 }
 0x1df   : > { %519 = vsyncadd %s1080_s14, %s518_s12  ;;  %p650_p12 = scmp.ne.s32.totalorder %s1014_s11, 0  ;;  %s661_s26 = sshll.u32 %s900_s25, 7 }
 0x1e0   : > { %s1024_s16 = scalar_lea.hbm %s1077_s6, %s661_s26  ;;  %s524_s13 = sshll.u32 %s960_s17, 4  ;;  %s1027_s13 = int_to_ptr.vmem [resolvable:$true] %s524_s13 }
 0x1e1   : > { %s770_s18 = scalar_lea.vmem %s1027_s13, %s1014_s11  ;;  %s841_s29 = smov [#allocation4]  }
 0x1e2   : > { %p771_p5 = scmp.ne.s32.totalorder %s1027_s13, %s770_s18  ;;  %s774_s10 = sshll.u32 %s841_s29, 4  ;;  %s775_s10 = int_to_ptr.vmem [resolvable:$false] %s774_s10 }
 0x1e3   : > { %s776_s25 = scalar_lea.vmem %s775_s10, 256  ;;  %p777_p7 = scmp.lt.s32.totalorder %s1027_s13, %s775_s10 }
 0x1e4   : > { %p772_p3 = pnand %p771_p5, %p650_p12  ;;  %p778_p8 = scmp.lt.s32.totalorder %s776_s25, %s770_s18 }
 0x1e6   : > { %p773_p4 = pneg %p772_p3  ;;  %p779_p9 = por %p778_p8, %p777_p7 }
 0x1e8   : > { %p780_p10 = pnand %p779_p9, %p773_p4 }
 0x1ea   : > { %783 = shalt.err (!%p780_p10)
}
 0x1eb   : > { %s784_s17 = scalar_lea.hbm %s1024_s16, %s1014_s11  ;;  %s788_s20 = scalar_lea.hbm %s1077_s6, 192 }
 0x1ec   : > { %p785_p11 = scmp.ne.s32.totalorder %s1024_s16, %s784_s17  ;;  %p789_p1 = scmp.lt.s32.totalorder %s1024_s16, %s1077_s6 }
 0x1ed   : > { %p790_p2 = scmp.lt.s32.totalorder %s788_s20, %s784_s17 }
 0x1ee   : > { %p786_p13 = pnand %p785_p11, %p650_p12 }
 0x1ef   : > { %p791_p5 = por %p790_p2, %p789_p1 }
 0x1f0   : > { %p787_p0 = pneg %p786_p13 }
 0x1f2   : > { %p792_p3 = pnand %p791_p5, %p787_p0 }
 0x1f4   : > { %795 = shalt.err (!%p792_p3)
}
 0x1f5   : > { %s842_s26 = smov 64   ;;  %s843_s7 = smov 4  }
 0x1f6   : > { %s1081_s9 = scalar_lea.sflag [#allocation5], %s957_s15 }
 0x1f7   : > { %530 = dma.vmem_to_hbm [thread:$0]  (%p650_p12), %s1027_s13, %s1014_s11, %s1024_s16, %s1081_s9, %s842_s26, %s842_s26, %s843_s7  }
 0x1f8 PF: > { %p699_p4 = scmp.ge.s32.totalorder %s834_s24, 2  ;;  %s539_s18 = sand.u32 1, %s822_s21  }
 0x1f9   : > { %s540_s29 = scalar_lea.sflag [#allocation3], %s539_s18 }
 0x1fa   : > { %p693_p7 = pnand %p699_p4, %p921_p6 }
 0x1fc   : > { %p694_p8 = pneg %p693_p7 }
 0x1fe   : > { %813 = dma.done.wait (%p694_p8), %s540_s29, 128  }
 0x1ff   : > { %815 = vsyncadd (%p694_p8), %s540_s29, 4294967168  ;;  %s549_s10 = scalar_lea.sflag [#allocation5], %s539_s18 }
 0x200   : > { %817 = dma.done.wait (%p694_p8), %s549_s10, 128  }
 0x201   : > { %819 = vsyncadd (%p694_p8), %s549_s10, 4294967168  ;;  %p20_p12 = scmp.ge.s32.totalorder %s904_s27, 4   ;;  %s1082_s21 = smov %s826_s22 }
 0x202   : > { %s1083_s22 = smov %s830_s23  ;;  %s1084_s23 = smov %s915_s30 }
 0x203   : > { %s1085_s24 = smov %s904_s27  ;;  %22 = sbr.rel (!%p20_p12) target bundleno = 5 (0x5), region = 92 }
 0x208   :  { %554 = vsyncpa [#allocation3], 1 }
 0x209   :  { %556 = vsyncpa [#allocation3 + $0x1], 1 }
 0x20a   :  { %557 = vsyncpa [#allocation5], 1 }
 0x20b   :  { %559 = vsyncpa [#allocation5 + $0x1], 1 }

// kernel: tpu_custom_call.1
= control target key start
LH: loop header
LB: loop body
LE: loop exit
PB: predicated region body
PF: predicated region fallthrough
CT: control target
= control target key end

     0   :  { %12 = vsyncpa [#allocation3], 0  ;;  %s1071_s0 = inlined_call_operand.vmem [shape: f32[20,64], index: 0, kind: input, shape index: {}]   ;;  %s1072_s1 = inlined_call_operand.vmem [shape: bf16[64,32], index: 1, kind: input, shape index: {}]   ;;  %s1073_s2 = inlined_call_operand.vmem [shape: f32[1,32], index: 2, kind: input, shape index: {}]   ;;  %s1074_s3 = inlined_call_operand.vmem [shape: bf16[32,64], index: 3, kind: input, shape index: {}]   ;;  %s1075_s4 = inlined_call_operand.vmem [shape: f32[1,64], index: 4, kind: input, shape index: {}]   ;;  %s1076_s5 = inlined_call_operand.hbm [shape: bf16[20,64], index: 5, kind: output, shape index: {0}]   ;;  %s1077_s6 = inlined_call_operand.hbm [shape: bf16[20,32], index: 6, kind: output, shape index: {1}]  }
   0x1   :  { %14 = vsyncpa [#allocation3 + $0x1], 0 }
   0x2   :  { %15 = vsyncpa [#allocation5], 0 }
   0x3   :  { %17 = vsyncpa [#allocation5 + $0x1], 0  ;;  %s879_s21 = smov 0   ;;  %s881_s22 = smov 0  }
   0x4   :  { %s883_s23 = smov 0   ;;  %s885_s24 = smov 0  }
   0x5 LB: > { %s900_s25 = sadd.s32 4294967295, %s834_s24   ;;  %s618_s26 = sadd.s32 4294967294, %s834_s24   ;;  %s834_s24 = sphi %s885_s24, %s1085_s24   ;;  %s830_s23 = sphi %s883_s23, %s1084_s23   ;;  %s826_s22 = sphi %s881_s22, %s1083_s22   ;;  %s822_s21 = sphi %s879_s21, %s1082_s21  }
   0x6   : > { %s904_s27 = sadd.s32 1, %s834_s24   ;;  %s140_s28 = sadd.s32 1, %s830_s23 }
   0x7   : > { %s137_s29 = ssub.s32 %s834_s24, %s904_s27  ;;  %p150_p0 = scmp.ne.s32.totalorder %s830_s23, %s826_s22 }
   0x8   : > { %p138_p1 = scmp.eq.s32.totalorder %s137_s29, 0  ;;  %p151_p2 = scmp.eq.s32.totalorder %s900_s25, 1 }
   0x9   : > { %p156_p3 = scmp.ne.s32.totalorder %s826_s22, %s822_s21  ;;  %p157_p4 = scmp.eq.s32.totalorder %s618_s26, 1 }
   0xa   : > { %s915_s30 = scalar_select %p138_p1, %s830_s23, %s140_s28  }
   0xb   : > { %p917_p5 = por %p151_p2, %p150_p0  ;;  %p921_p6 = por %p157_p4, %p156_p3 }
   0xc   : > { %p621_p7 = scmp.ge.s32.totalorder %s834_s24, 1  ;;  %p230_p8 = scmp.lt.s32.totalorder %s834_s24, 3 }
   0xe   : > { %p231_p9 = pnand %p621_p7, %p230_p8 }
   0xf   : > { %s934_s13 = sshll.u32 (!%p231_p9), %s900_s25, 1  ;;  %s957_s15 = sand.u32 (!%p231_p9), 1, %s826_s22  }
  0x10   : > { %234 = sbr.rel (%p231_p9) target bundleno = 504 (0x1f8), region = 40  ;;  %p274_p10 = scmp.lt.s32.totalorder (!%p231_p9), %s934_s13, 2 }
  0x11   : > { %s622_s16 = sshll.u32 (!%p231_p9), %s957_s15, 3  ;;  %s478_s26 = scalar_lea.sflag (!%p231_p9), [#allocation3], %s957_s15 }
  0x15   : > { %v738_v0 = vld [vmem:[%s1072_s1 + $0x18] sm:$0xff]   ;;  %v836_v1 = vmov 0.0   ;;  %v739_v2 = vld [vmem:[%s1072_s1 + $0x10] sm:$0xff]   ;;  %vm837_vm0 = vmmov 0   ;;  %s275_s14 = scalar_select %p274_p10, %s934_s13, 2  ;;  %v740_v3 = vld [vmem:[%s1072_s1 + $0x8] sm:$0xff]  }
  0x16   : > { %670 = vmatprep.subr.bf16.mxu0 %v836_v1  ;;  %682 = vmatprep.subr.bf16.mxu1 %v836_v1  ;;  %v741_v4 = vld [vmem:[%s1072_s1] sm:$0xff]   ;;  %vm336_vm1 = vcmask 523264   ;;  %v742_v8 = vld [vmem:[%s1074_s3 + $0x8] sm:$0xff]   ;;  %vm395_vm3 = vcmask 257024   ;;  %vm421_vm5 = vcmask 261120   ;;  %vm474_vm6 = vcmask 519168  }
  0x17   : > { %671 = vmatpush3.bf16.msra.mxu0 %v738_v0  ;;  %678 = vmatprep.mubr.msk.bf16.mxu0 %vm837_vm0, %v836_v1  ;;  %s625_s17 = sshll.u32 %s275_s14, 3  ;;  %v743_v9 = vld [vmem:[%s1074_s3] sm:$0xff]   ;;  %s491_s29 = ssub.s32 (%p917_p5), 3, %s934_s13 }
  0x18   : > { %672 = vmatprep.subr.bf16.mxu0 %v836_v1  ;;  %686 = vmatprep.mubr.msk.bf16.mxu1 %vm837_vm0, %v836_v1  ;;  %s277_s20 = scalar_lea.vmem %s1071_s0, %s625_s17  ;;  %v626_v10 = vld [vmem:[%s1073_s2] ss:$0 sm:$0xff]  ;;  %s960_s17 = scalar_lea.vmem [#allocation4], %s622_s16 }
  0x19   : > { %v294_v5 = vld [vmem:[%s277_s20] sm:$0xff]  ;;  %v295_v6 = vld [vmem:[%s277_s20 + $0x8] sm:$0xff]  ;;  %683 = vmatpush3.bf16.msra.mxu1 %v742_v8  ;;  %s261_s20 = scalar_lea.vmem [#allocation2], %s622_s16  ;;  %p492_p11 = scmp.lt.s32.totalorder (%p917_p5), %s491_s29, 2 }
  0x1a   : > { %v296_v7 = vpack.c.bf16 %v295_v6, %v294_v5  ;;  %684 = vmatprep.subr.bf16.mxu1 %v836_v1  ;;  %v634_v24 = vld [vmem:[%s1075_s4] ss:$0 sm:$0xff] }
  0x1b   : > { %673 = vmatpush3.bf16.msra.mxu0 %v739_v2 }
  0x1c   : > { %674 = vmatprep.subr.bf16.mxu0 %v836_v1 }
  0x1d   : > { %685 = vmatpush3.bf16.msra.mxu1 %v743_v9 }
  0x1f   : > { %675 = vmatpush3.bf16.msra.mxu0 %v740_v3 }
  0x20   : > { %676 = vmatprep.subr.bf16.mxu0 %v836_v1 }
  0x23   : > { %677 = vmatpush3.bf16.msra.mxu0 %v741_v4 }
  0x26   : > { %679 = vmatmul.mubr.msk.bf16.vlgmr.msra.gmra.mxu0 %vm336_vm1, %v296_v7 }
  0xe6   : > { %v374_v11 = vpop.f32.mrf.mxu0 }
  0xe7   : > { %v375_v12 = vadd.f32 %v626_v10, %v374_v11 }
  0xe8   : > { %v680_v13 = vpop.f32.mrf.mxu0 }
  0xe9   : > { %vm381_vm2 = vcmp.gt.f32.partialorder %v375_v12, 0.0  ;;  %v383_v14 = vmul.f32 0.1, %v375_v12 }
  0xea   : > { %v377_v15 = vpop.f32.mrf.mxu0 }
  0xeb   : > { %v385_v16 = vsel %vm381_vm2, %v375_v12, %v383_v14  ;;  %v378_v17 = vadd.f32 %v626_v10, %v377_v15 }
  0xec   : > { %v656_v18 = vpack.c.bf16 %v385_v16, %v385_v16  ;;  %v681_v19 = vpop.f32.mrf.mxu0 }
  0xed   : > { %vm382_vm4 = vcmp.gt.f32.partialorder %v378_v17, 0.0  ;;  %v384_v20 = vmul.f32 0.1, %v378_v17 }
  0xee   : > { %396 = vst.msk [vmem:[%s960_s17] sm:$0xf] %vm395_vm3, %v656_v18 }
  0xef   : > { %v386_v21 = vsel %vm382_vm4, %v378_v17, %v384_v20 }
  0xf0   : > { %v387_v22 = vpack.c.bf16 %v386_v21, %v385_v16  ;;  %v657_v23 = vpack.c.bf16 %v386_v21, %v386_v21 }
  0xf2   : > { %687 = vmatmul.mubr.msk.bf16.vlgmr.msra.gmra.mxu1 %vm421_vm5, %v387_v22  ;;  %397 = vst.msk [vmem:[%s960_s17 + $0x4] sm:$0xf] %vm395_vm3, %v657_v23 }
 0x1b2   : > { %v459_v25 = vpop.f32.mrf.mxu1 }
 0x1b3   : > { %v460_v26 = vadd.f32 %v634_v24, %v459_v25 }
 0x1b4   : > { %v688_v27 = vpop.f32.mrf.mxu1 }
 0x1b5   : > { %v658_v28 = vpack.c.bf16 %v460_v26, %v460_v26 }
 0x1b6   : > { %v462_v29 = vpop.f32.mrf.mxu1 }
 0x1b7   : > { %475 = vst.msk [vmem:[%s261_s20] sm:$0xf] %vm474_vm6, %v658_v28  ;;  %v463_v30 = vadd.f32 %v634_v24, %v462_v29  ;;  %489 = sbr.rel (!%p917_p5) target bundleno = 471 (0x1d7), region = 44 }
 0x1b8   : > { %v689_v31 = vpop.f32.mrf.mxu1 }
 0x1b9   : > { %v659_v32 = vpack.c.bf16 %v463_v30, %v463_v30 }
 0x1bb   : > { %476 = vst.msk [vmem:[%s261_s20 + $0x4] sm:$0xf] %vm474_vm6, %v659_v32 }
 0x1bc   : > { %s1087_s29 = smov (!%p492_p11, %s491_s29), 2 }
 0x1bd   : > { %s972_s9 = sshll.u32 %s1087_s29, 6 }
 0x1be   : > { %s496_s10 = ssub.s32 128, %s972_s9 }
 0x1bf   : > { %497 = vsyncadd %s478_s26, %s496_s10  ;;  %p644_p12 = scmp.ne.s32.totalorder %s972_s9, 0  ;;  %s660_s11 = sshll.u32 %s900_s25, 7 }
 0x1c0   : > { %s982_s16 = scalar_lea.hbm %s1076_s5, %s660_s11  ;;  %s502_s18 = sshll.u32 %s261_s20, 4  ;;  %s984_s18 = int_to_ptr.vmem [resolvable:$true] %s502_s18 }
 0x1c1   : > { %s744_s19 = scalar_lea.vmem %s984_s18, %s972_s9  ;;  %s838_s29 = smov [#allocation2]  }
 0x1c2   : > { %p745_p13 = scmp.ne.s32.totalorder %s984_s18, %s744_s19  ;;  %s748_s10 = sshll.u32 %s838_s29, 4  ;;  %s749_s10 = int_to_ptr.vmem [resolvable:$false] %s748_s10 }
 0x1c3   : > { %s750_s28 = scalar_lea.vmem %s749_s10, 256  ;;  %p751_p2 = scmp.lt.s32.totalorder %s984_s18, %s749_s10 }
 0x1c4   : > { %p746_p0 = pnand %p745_p13, %p644_p12  ;;  %p752_p3 = scmp.lt.s32.totalorder %s750_s28, %s744_s19 }
 0x1c6   : > { %p747_p1 = pneg %p746_p0  ;;  %p753_p4 = por %p752_p3, %p751_p2 }
 0x1c8   : > { %p754_p7 = pnand %p753_p4, %p747_p1 }
 0x1ca   : > { %757 = shalt.err (!%p754_p7)
}
 0x1cb   : > { %s758_s20 = scalar_lea.hbm %s982_s16, %s972_s9  ;;  %s762_s14 = scalar_lea.hbm %s1076_s5, 192 }
 0x1cc   : > { %p759_p8 = scmp.ne.s32.totalorder %s982_s16, %s758_s20  ;;  %p763_p11 = scmp.lt.s32.totalorder %s982_s16, %s1076_s5 }
 0x1cd   : > { %p764_p13 = scmp.lt.s32.totalorder %s762_s14, %s758_s20 }
 0x1ce   : > { %p760_p9 = pnand %p759_p8, %p644_p12 }
 0x1cf   : > { %p765_p0 = por %p764_p13, %p763_p11 }
 0x1d0   : > { %p761_p10 = pneg %p760_p9 }
 0x1d2   : > { %p766_p1 = pnand %p765_p0, %p761_p10 }
 0x1d4   : > { %769 = shalt.err (!%p766_p1)
}
 0x1d5   : > { %s839_s28 = smov 64   ;;  %s840_s19 = smov 4  }
 0x1d6   : > { %508 = dma.vmem_to_hbm [thread:$0]  (%p644_p12), %s984_s18, %s972_s9, %s982_s16, %s478_s26, %s839_s28, %s839_s28, %s840_s19  }
 0x1d7 PF: > { %511 = sbr.rel (!%p917_p5) target bundleno = 504 (0x1f8), region = 48  ;;  %s513_s20 = ssub.s32 (%p917_p5), 3, %s934_s13 }
 0x1d8   : > { %p514_p2 = scmp.lt.s32.totalorder (%p917_p5), %s513_s20, 2  ;;  %s1080_s14 = scalar_lea.sflag (%p917_p5), [#allocation5], %s957_s15 }
 0x1dc   : > { %s1089_s20 = smov (!%p514_p2, %s513_s20), 2 }
 0x1dd   : > { %s1014_s11 = sshll.u32 %s1089_s20, 6 }
 0x1de   : > { %s518_s12 = ssub.s32 128, %s1014_s11 }
 0x1df   : > { %519 = vsyncadd %s1080_s14, %s518_s12  ;;  %p650_p12 = scmp.ne.s32.totalorder %s1014_s11, 0  ;;  %s661_s26 = sshll.u32 %s900_s25, 7 }
 0x1e0   : > { %s1024_s16 = scalar_lea.hbm %s1077_s6, %s661_s26  ;;  %s524_s13 = sshll.u32 %s960_s17, 4  ;;  %s1027_s13 = int_to_ptr.vmem [resolvable:$true] %s524_s13 }
 0x1e1   : > { %s770_s18 = scalar_lea.vmem %s1027_s13, %s1014_s11  ;;  %s841_s29 = smov [#allocation4]  }
 0x1e2   : > { %p771_p5 = scmp.ne.s32.totalorder %s1027_s13, %s770_s18  ;;  %s774_s10 = sshll.u32 %s841_s29, 4  ;;  %s775_s10 = int_to_ptr.vmem [resolvable:$false] %s774_s10 }
 0x1e3   : > { %s776_s25 = scalar_lea.vmem %s775_s10, 256  ;;  %p777_p7 = scmp.lt.s32.totalorder %s1027_s13, %s775_s10 }
 0x1e4   : > { %p772_p3 = pnand %p771_p5, %p650_p12  ;;  %p778_p8 = scmp.lt.s32.totalorder %s776_s25, %s770_s18 }
 0x1e6   : > { %p773_p4 = pneg %p772_p3  ;;  %p779_p9 = por %p778_p8, %p777_p7 }
 0x1e8   : > { %p780_p10 = pnand %p779_p9, %p773_p4 }
 0x1ea   : > { %783 = shalt.err (!%p780_p10)
}
 0x1eb   : > { %s784_s17 = scalar_lea.hbm %s1024_s16, %s1014_s11  ;;  %s788_s20 = scalar_lea.hbm %s1077_s6, 192 }
 0x1ec   : > { %p785_p11 = scmp.ne.s32.totalorder %s1024_s16, %s784_s17  ;;  %p789_p1 = scmp.lt.s32.totalorder %s1024_s16, %s1077_s6 }
 0x1ed   : > { %p790_p2 = scmp.lt.s32.totalorder %s788_s20, %s784_s17 }
 0x1ee   : > { %p786_p13 = pnand %p785_p11, %p650_p12 }
 0x1ef   : > { %p791_p5 = por %p790_p2, %p789_p1 }
 0x1f0   : > { %p787_p0 = pneg %p786_p13 }
 0x1f2   : > { %p792_p3 = pnand %p791_p5, %p787_p0 }
 0x1f4   : > { %795 = shalt.err (!%p792_p3)
}
 0x1f5   : > { %s842_s26 = smov 64   ;;  %s843_s7 = smov 4  }
 0x1f6   : > { %s1081_s9 = scalar_lea.sflag [#allocation5], %s957_s15 }
 0x1f7   : > { %530 = dma.vmem_to_hbm [thread:$0]  (%p650_p12), %s1027_s13, %s1014_s11, %s1024_s16, %s1081_s9, %s842_s26, %s842_s26, %s843_s7  }
 0x1f8 PF: > { %p699_p4 = scmp.ge.s32.totalorder %s834_s24, 2  ;;  %s539_s18 = sand.u32 1, %s822_s21  }
 0x1f9   : > { %s540_s29 = scalar_lea.sflag [#allocation3], %s539_s18 }
 0x1fa   : > { %p693_p7 = pnand %p699_p4, %p921_p6 }
 0x1fc   : > { %p694_p8 = pneg %p693_p7 }
 0x1fe   : > { %813 = dma.done.wait (%p694_p8), %s540_s29, 128  }
 0x1ff   : > { %815 = vsyncadd (%p694_p8), %s540_s29, 4294967168  ;;  %s549_s10 = scalar_lea.sflag [#allocation5], %s539_s18 }
 0x200   : > { %817 = dma.done.wait (%p694_p8), %s549_s10, 128  }
 0x201   : > { %819 = vsyncadd (%p694_p8), %s549_s10, 4294967168  ;;  %p20_p12 = scmp.ge.s32.totalorder %s904_s27, 4   ;;  %s1082_s21 = smov %s826_s22 }
 0x202   : > { %s1083_s22 = smov %s830_s23  ;;  %s1084_s23 = smov %s915_s30 }
 0x203   : > { %s1085_s24 = smov %s904_s27  ;;  %22 = sbr.rel (!%p20_p12) target bundleno = 5 (0x5), region = 92 }
 0x208   :  { %554 = vsyncpa [#allocation3], 1 }
 0x209   :  { %556 = vsyncpa [#allocation3 + $0x1], 1 }
 0x20a   :  { %557 = vsyncpa [#allocation5], 1 }
 0x20b   :  { %559 = vsyncpa [#allocation5 + $0x1], 1 }

</bundles_post_ra>
